<compile_context>
chip_gen: v6e
topology: v6e:2x2x1
jax: 0.10.0
libtpu: 0.0.40
codegen_flags: <defaults>
</compile_context>

<pallas_src>
import jax
import jax.numpy as jnp
from jax.experimental import pallas as pl
from jax.experimental.pallas import tpu as pltpu

_LANE = 128     # lane width (last dim)
_SUBLANE = 8    # f32 sublane alignment (second-to-last dim)


def _round_up(x, m):
    return (x + m - 1) // m * m


def _mlp_kernel(x_ref, w1_ref, b1_ref, w2_ref, b2_ref, o_ref):
    # Cast the activation tile to the weight (matmul) dtype; accumulate in f32 on the MXU.
    x = x_ref[...].astype(w1_ref.dtype)
    h = jnp.dot(x, w1_ref[...], preferred_element_type=jnp.float32)
    h = jnp.maximum(h + b1_ref[...], 0.0)                     # bias + ReLU in f32
    y = jnp.dot(h.astype(w2_ref.dtype), w2_ref[...],
                preferred_element_type=jnp.float32)
    y = jnp.maximum(y + b2_ref[...], 0.0)                     # bias + ReLU in f32
    # Dropout is identity in eval mode.
    o_ref[...] = y.astype(o_ref.dtype)


def tembed_cond_pred_head(x, w1, b1, w2, b2, *, batch_tile=None,
                          compute_dtype=jnp.bfloat16):
    """Fused MLP head.  x: [B, F_in] -> [B, F_out] (eval-mode forward)."""
    B, F_in = x.shape
    H = w1.shape[1]
    F_out = w2.shape[1]

    # ---- lane-dense feature padding (multiples of 128) ----------------------
    F_in_p = _round_up(F_in, _LANE)
    H_p = _round_up(H, _LANE)
    F_out_p = _round_up(F_out, _LANE)

    # ---- batch tiling: multiple of 8 rows, large enough to amortize DMA -----
    if batch_tile is None:
        batch_tile = min(_round_up(B, _SUBLANE), 512)
    batch_tile = _round_up(batch_tile, _SUBLANE)
    assert batch_tile % _SUBLANE == 0
    B_p = _round_up(B, batch_tile)
    grid = (B_p // batch_tile,)

    # Zero padding is neutral for matmul / bias / ReLU, so the values in the
    # original rows/cols are unchanged; the padding is sliced off at the end.
    x_p = jnp.pad(x, ((0, B_p - B), (0, F_in_p - F_in)))
    w1_p = jnp.pad(w1, ((0, F_in_p - F_in), (0, H_p - H))).astype(compute_dtype)
    w2_p = jnp.pad(w2, ((0, H_p - H), (0, F_out_p - F_out))).astype(compute_dtype)
    b1_p = jnp.pad(b1.reshape(1, -1), ((0, 0), (0, H_p - H))).astype(jnp.float32)
    b2_p = jnp.pad(b2.reshape(1, -1), ((0, 0), (0, F_out_p - F_out))).astype(jnp.float32)

    # ---- explicit VMEM budget (double-buffered in/out tiles + f32 scratch) --
    x_item = x_p.dtype.itemsize
    w_item = jnp.dtype(compute_dtype).itemsize
    o_item = jnp.dtype(x.dtype).itemsize
    tile_bytes = (batch_tile * F_in_p * x_item          # x tile
                  + F_in_p * H_p * w_item               # W1 (resident)
                  + H_p * F_out_p * w_item              # W2 (resident)
                  + (H_p + F_out_p) * 4                 # biases (f32)
                  + batch_tile * F_out_p * o_item)      # out tile
    vmem_bytes = 2 * tile_bytes + 4 * batch_tile * (H_p + F_out_p) + (1 << 20)
    vmem_bytes = int(min(max(vmem_bytes, 16 << 20), 100 << 20))

    # ---- advisory cost estimate for XLA scheduling ---------------------------
    flops = 2 * B_p * (F_in_p * H_p + H_p * F_out_p)
    bytes_accessed = (x_p.size * x_item + w1_p.size * w_item + w2_p.size * w_item
                      + (b1_p.size + b2_p.size) * 4 + B_p * F_out_p * o_item)
    cost = pl.CostEstimate(flops=int(flops), transcendentals=0,
                           bytes_accessed=int(bytes_accessed))

    out = pl.pallas_call(
        _mlp_kernel,
        out_shape=jax.ShapeDtypeStruct((B_p, F_out_p), x.dtype),
        grid_spec=pltpu.PrefetchScalarGridSpec(
            num_scalar_prefetch=0,
            grid=grid,
            in_specs=[
                pl.BlockSpec((batch_tile, F_in_p), lambda i: (i, 0)),   # x tile (streamed)
                pl.BlockSpec((F_in_p, H_p), lambda i: (0, 0)),          # W1 (resident)
                pl.BlockSpec((1, H_p), lambda i: (0, 0)),               # b1 (resident)
                pl.BlockSpec((H_p, F_out_p), lambda i: (0, 0)),         # W2 (resident)
                pl.BlockSpec((1, F_out_p), lambda i: (0, 0)),           # b2 (resident)
            ],
            out_specs=pl.BlockSpec((batch_tile, F_out_p), lambda i: (i, 0)),
        ),
        compiler_params=pltpu.CompilerParams(
            dimension_semantics=("parallel",),
            vmem_limit_bytes=vmem_bytes),
        cost_estimate=cost,
    )(x_p, w1_p, b1_p, w2_p, b2_p)

    return out[:B, :F_out]


def init_params(key, in_features, hidden_features, out_features, dtype=jnp.float32):
    """Deterministic PyTorch-style Linear init: U(-1/sqrt(fan_in), 1/sqrt(fan_in))."""
    h0 = hidden_features[0]
    k1, k2, k3, k4 = jax.random.split(key, 4)
    lim1 = 1.0 / jnp.sqrt(jnp.asarray(in_features, jnp.float32))
    lim2 = 1.0 / jnp.sqrt(jnp.asarray(h0, jnp.float32))
    w1 = jax.random.uniform(k1, (in_features, h0), dtype, -lim1, lim1)
    b1 = jax.random.uniform(k2, (1, h0), dtype, -lim1, lim1)
    w2 = jax.random.uniform(k3, (h0, out_features), dtype, -lim2, lim2)
    b2 = jax.random.uniform(k4, (1, out_features), dtype, -lim2, lim2)
    return w1, b1, w2, b2


if __name__ == "__main__":
    # Small shapes consistent with the module: x is [batch, in_features].
    batch = 8
    in_features = 32
    hidden_features = [64]
    out_features = 16

    key = jax.random.PRNGKey(0)
    kx, kp = jax.random.split(key)
    x = jax.random.normal(kx, (batch, in_features), jnp.float32)
    w1, b1, w2, b2 = init_params(kp, in_features, hidden_features, out_features)

    out = tembed_cond_pred_head(x, w1, b1, w2, b2)
    out = jax.block_until_ready(out)
    assert out.shape == (batch, out_features)

    # Reference mirroring the kernel's mixed precision (bf16 MXU operands, f32 accum).
    cd = jnp.bfloat16
    h_ref = jnp.maximum(
        jnp.dot(x.astype(cd), w1.astype(cd), preferred_element_type=jnp.float32) + b1, 0.0)
    ref = jnp.maximum(
        jnp.dot(h_ref.astype(cd), w2.astype(cd), preferred_element_type=jnp.float32) + b2, 0.0)
    assert jnp.allclose(out, ref, atol=5e-3, rtol=5e-3)

    # Sanity check against the pure-f32 eval-mode forward of the PyTorch module.
    ref_f32 = jnp.maximum(jnp.maximum(x @ w1 + b1, 0.0) @ w2 + b2, 0.0)
    assert jnp.allclose(out, ref_f32, atol=5e-2, rtol=5e-2)

    print("KERNEL_OK")
</pallas_src>

<mosaic_0001>
module attributes {stable_mosaic.version = 11 : i64} {
  func.func @_mlp_kernel(%arg0: i32, %arg1: memref<8x128xf32, #tpu.memory_space<vmem>>, %arg2: memref<128x128xbf16, #tpu.memory_space<vmem>>, %arg3: memref<1x128xf32, #tpu.memory_space<vmem>>, %arg4: memref<128x128xbf16, #tpu.memory_space<vmem>>, %arg5: memref<1x128xf32, #tpu.memory_space<vmem>>, %arg6: memref<8x128xf32, #tpu.memory_space<vmem>>) attributes {dimension_semantics = [#tpu.dimension_semantics<parallel>], iteration_bounds = array<i64: 1>, scalar_prefetch = 0 : i64, scratch_operands = 0 : i64, tpu.core_type = #tpu.core_type<tc>, window_params = [{transform_indices = @transform_0, window_bounds = array<i64: 8, 128>}, {pipeline_mode = #tpu.pipeline_mode<synchronous>, transform_indices = @transform_1, window_bounds = array<i64: 128, 128>}, {pipeline_mode = #tpu.pipeline_mode<synchronous>, transform_indices = @transform_2, window_bounds = array<i64: 1, 128>}, {pipeline_mode = #tpu.pipeline_mode<synchronous>, transform_indices = @transform_3, window_bounds = array<i64: 128, 128>}, {pipeline_mode = #tpu.pipeline_mode<synchronous>, transform_indices = @transform_4, window_bounds = array<i64: 1, 128>}, {transform_indices = @transform_5, window_bounds = array<i64: 8, 128>}]} {
    %c0 = arith.constant 0 : index
    %c0_0 = arith.constant 0 : index
    %0 = vector.load %arg1[%c0, %c0_0] : memref<8x128xf32, #tpu.memory_space<vmem>>, vector<8x128xf32>
    %1 = arith.truncf %0 : vector<8x128xf32> to vector<8x128xbf16>
    %c0_1 = arith.constant 0 : index
    %c0_2 = arith.constant 0 : index
    %2 = vector.load %arg2[%c0_1, %c0_2] : memref<128x128xbf16, #tpu.memory_space<vmem>>, vector<128x128xbf16>
    %cst = arith.constant dense<0.000000e+00> : vector<8x128xf32>
    %3 = tpu.matmul %1, %2, %cst {dimension_numbers = #tpu.dot_dimension_numbers<[1], [0], [0], [1], [0, 0, 1, 1], [], []>} : vector<8x128xbf16>, vector<128x128xbf16>, vector<8x128xf32> -> vector<8x128xf32>
    %c0_3 = arith.constant 0 : index
    %c0_4 = arith.constant 0 : index
    %4 = vector.load %arg3[%c0_3, %c0_4] : memref<1x128xf32, #tpu.memory_space<vmem>>, vector<1x128xf32>
    %5 = vector.broadcast %4 : vector<1x128xf32> to vector<8x128xf32>
    %6 = arith.addf %3, %5 : vector<8x128xf32>
    %cst_5 = arith.constant 0.000000e+00 : f32
    %7 = vector.broadcast %cst_5 : f32 to vector<8x128xf32>
    %8 = arith.maximumf %6, %7 : vector<8x128xf32>
    %9 = arith.truncf %8 : vector<8x128xf32> to vector<8x128xbf16>
    %c0_6 = arith.constant 0 : index
    %c0_7 = arith.constant 0 : index
    %10 = vector.load %arg4[%c0_6, %c0_7] : memref<128x128xbf16, #tpu.memory_space<vmem>>, vector<128x128xbf16>
    %cst_8 = arith.constant dense<0.000000e+00> : vector<8x128xf32>
    %11 = tpu.matmul %9, %10, %cst_8 {dimension_numbers = #tpu.dot_dimension_numbers<[1], [0], [0], [1], [0, 0, 1, 1], [], []>} : vector<8x128xbf16>, vector<128x128xbf16>, vector<8x128xf32> -> vector<8x128xf32>
    %c0_9 = arith.constant 0 : index
    %c0_10 = arith.constant 0 : index
    %12 = vector.load %arg5[%c0_9, %c0_10] : memref<1x128xf32, #tpu.memory_space<vmem>>, vector<1x128xf32>
    %13 = vector.broadcast %12 : vector<1x128xf32> to vector<8x128xf32>
    %14 = arith.addf %11, %13 : vector<8x128xf32>
    %cst_11 = arith.constant 0.000000e+00 : f32
    %15 = vector.broadcast %cst_11 : f32 to vector<8x128xf32>
    %16 = arith.maximumf %14, %15 : vector<8x128xf32>
    %c0_12 = arith.constant 0 : index
    %c0_13 = arith.constant 0 : index
    %17 = vector.load %arg6[%c0_12, %c0_13] : memref<8x128xf32, #tpu.memory_space<vmem>>, vector<8x128xf32>
    tpu.vector_store %arg6[%c0_12, %c0_13], %16 {strides = array<i32>} : memref<8x128xf32, #tpu.memory_space<vmem>>, vector<8x128xf32>,
    return
  }
  func.func @transform_0(%arg0: i32) -> (i32, i32) {
    %c0_i32 = arith.constant 0 : i32
    %c0_i32_0 = arith.constant 0 : i32
    return %arg0, %c0_i32 : i32, i32
  }
  func.func @transform_1(%arg0: i32) -> (i32, i32) {
    %c0_i32 = arith.constant 0 : i32
    %c0_i32_0 = arith.constant 0 : i32
    %c0_i32_1 = arith.constant 0 : i32
    return %c0_i32, %c0_i32_0 : i32, i32
  }
  func.func @transform_2(%arg0: i32) -> (i32, i32) {
    %c0_i32 = arith.constant 0 : i32
    %c0_i32_0 = arith.constant 0 : i32
    %c0_i32_1 = arith.constant 0 : i32
    return %c0_i32, %c0_i32_0 : i32, i32
  }
  func.func @transform_3(%arg0: i32) -> (i32, i32) {
    %c0_i32 = arith.constant 0 : i32
    %c0_i32_0 = arith.constant 0 : i32
    %c0_i32_1 = arith.constant 0 : i32
    return %c0_i32, %c0_i32_0 : i32, i32
  }
  func.func @transform_4(%arg0: i32) -> (i32, i32) {
    %c0_i32 = arith.constant 0 : i32
    %c0_i32_0 = arith.constant 0 : i32
    %c0_i32_1 = arith.constant 0 : i32
    return %c0_i32, %c0_i32_0 : i32, i32
  }
  func.func @transform_5(%arg0: i32) -> (i32, i32) {
    %c0_i32 = arith.constant 0 : i32
    %c0_i32_0 = arith.constant 0 : i32
    return %arg0, %c0_i32 : i32, i32
  }
}

</mosaic_0001>

<bundles_post_ra>
// kernel: tpu_custom_call.1
= control target key start
LH: loop header
LB: loop body
LE: loop exit
PB: predicated region body
PF: predicated region fallthrough
CT: control target
= control target key end

     0   :  { %10 = vsyncpa [#allocation3], 0  ;;  %s547_s0 = inlined_call_operand.hbm [shape: f32[8,128], index: 0, kind: input, shape index: {}]   ;;  %s548_s1 = inlined_call_operand.hbm [shape: bf16[128,128], index: 1, kind: input, shape index: {}]   ;;  %s549_s2 = inlined_call_operand.vmem [shape: f32[1,128], index: 2, kind: input, shape index: {}]   ;;  %s550_s3 = inlined_call_operand.hbm [shape: bf16[128,128], index: 3, kind: input, shape index: {}]   ;;  %s551_s4 = inlined_call_operand.vmem [shape: f32[1,128], index: 4, kind: input, shape index: {}]   ;;  %s552_s5 = inlined_call_operand.hbm [shape: f32[8,128], index: 5, kind: output, shape index: {}]  }
   0x1   :  { %11 = vsyncpa [#allocation6], 0 }
   0x2   :  { %12 = vsyncpa [#allocation4], 0  ;;  %s491_s18 = smov [#allocation5]  }
   0x3   :  { %s28_s19 = sshll.u32 %s491_s18, 4  ;;  %s29_s19 = int_to_ptr.vmem [resolvable:$true] %s28_s19 }
   0x4   :  { %s413_s20 = scalar_lea.vmem %s29_s19, 1024  ;;  %p418_p1 = scmp.lt.s32.totalorder %s29_s19, %s29_s19 }
   0x5   :  { %p414_p0 = scmp.ne.s32.totalorder %s29_s19, %s413_s20  ;;  %p419_p2 = scmp.lt.s32.totalorder %s413_s20, %s413_s20 }
   0x7   :  { %p420_p3 = por %p419_p2, %p418_p1 }
   0x9   :  { %p421_p4 = pnand %p420_p3, %p414_p0 }
   0xb   :  { %424 = shalt.err (!%p421_p4)
}
   0xc   :  { %s492_s21 = smov 64   ;;  %s493_s22 = smov 4  }
   0xd   :  { %34 = dma.hbm_to_vmem [thread:$0]  %s548_s1, 1024, %s29_s19, [#allocation6], %s492_s21, %s492_s21, %s493_s22  }
   0xe   :  { %s494_s25 = smov [#allocation2]   ;;  %s495_s27 = smov [#allocation7]  }
   0xf   :  { %s19_s26 = sshll.u32 %s494_s25, 4  ;;  %s42_s28 = sshll.u32 %s495_s27, 4  ;;  %s20_s26 = int_to_ptr.vmem [resolvable:$true] %s19_s26  ;;  %s43_s28 = int_to_ptr.vmem [resolvable:$true] %s42_s28 }
  0x10   :  { %s433_s29 = scalar_lea.vmem %s20_s26, 128  ;;  %p438_p6 = scmp.lt.s32.totalorder %s20_s26, %s20_s26 }
  0x11   :  { %p434_p5 = scmp.ne.s32.totalorder %s20_s26, %s433_s29  ;;  %p439_p7 = scmp.lt.s32.totalorder %s433_s29, %s433_s29 }
  0x13   :  { %p440_p8 = por %p439_p7, %p438_p6 }
  0x15   :  { %p441_p9 = pnand %p440_p8, %p434_p5 }
  0x17   :  { %444 = shalt.err (!%p441_p9)
}
  0x18   :  { %22 = dma.hbm_to_vmem [thread:$0]  %s547_s0, 128, %s20_s26, [#allocation3]  }
  0x19   :  { %s453_s7 = scalar_lea.vmem %s43_s28, 1024  ;;  %p458_p11 = scmp.lt.s32.totalorder %s43_s28, %s43_s28 }
  0x1a   :  { %p454_p10 = scmp.ne.s32.totalorder %s43_s28, %s453_s7  ;;  %p459_p12 = scmp.lt.s32.totalorder %s453_s7, %s453_s7 }
  0x1c   :  { %p460_p13 = por %p459_p12, %p458_p11 }
  0x1e   :  { %p461_p0 = pnand %p460_p13, %p454_p10 }
  0x20   :  { %464 = shalt.err (!%p461_p0)
}
  0x21   :  { %48 = dma.hbm_to_vmem [thread:$0]  %s550_s3, 1024, %s43_s28, [#allocation6], %s492_s21, %s492_s21, %s493_s22  }
  0x22   :  { %485 = dma.done.wait [#allocation3], 128  }
  0x23   :  { %486 = vsyncadd [#allocation3], 4294967168 }
  0x24   :  { %487 = dma.done.wait [#allocation6], 2048  }
  0x25   :  { %488 = vsyncadd [#allocation6], 4294965248  ;;  %v496_v0 = vmov 0.0   ;;  %vm497_vm0 = vmmov 0   ;;  %v389_v1 = vld [vmem:[#allocation5 + $0x38] sm:$0xff]   ;;  %v390_v2 = vld [vmem:[#allocation5 + $0x30] sm:$0xff]  }
  0x26   :  { %341 = vmatprep.subr.bf16.mxu0 %v496_v0  ;;  %357 = vmatprep.mubr.msk.bf16.mxu0 %vm497_vm0, %v496_v0  ;;  %v391_v3 = vld [vmem:[#allocation5 + $0x28] sm:$0xff]   ;;  %v397_v4 = vld [vmem:[#allocation7 + $0x38] sm:$0xff]   ;;  %v392_v5 = vld [vmem:[#allocation5 + $0x20] sm:$0xff]   ;;  %s498_s11 = smov [#allocation8]  }
  0x27   :  { %361 = vmatprep.subr.bf16.mxu1 %v496_v0  ;;  %377 = vmatprep.mubr.msk.bf16.mxu1 %vm497_vm0, %v496_v0  ;;  %v398_v6 = vld [vmem:[#allocation7 + $0x30] sm:$0xff]   ;;  %v393_v7 = vld [vmem:[#allocation5 + $0x18] sm:$0xff]   ;;  %v399_v8 = vld [vmem:[#allocation7 + $0x28] sm:$0xff]   ;;  %s295_s12 = sshll.u32 %s498_s11, 4  ;;  %s296_s12 = int_to_ptr.vmem [resolvable:$true] %s295_s12 }
  0x28   :  { %342 = vmatpush3.bf16.msra.mxu0 %v389_v1  ;;  %362 = vmatpush3.bf16.msra.mxu1 %v397_v4  ;;  %v394_v9 = vld [vmem:[#allocation5 + $0x10] sm:$0xff]   ;;  %v400_v10 = vld [vmem:[#allocation7 + $0x20] sm:$0xff]   ;;  %v395_v11 = vld [vmem:[#allocation5 + $0x8] sm:$0xff]   ;;  %p470_p2 = scmp.lt.s32.totalorder %s296_s12, %s296_s12 }
  0x29   :  { %343 = vmatprep.subr.bf16.mxu0 %v496_v0  ;;  %363 = vmatprep.subr.bf16.mxu1 %v496_v0  ;;  %v401_v12 = vld [vmem:[#allocation7 + $0x18] sm:$0xff]   ;;  %v396_v13 = vld [vmem:[#allocation5] sm:$0xff]   ;;  %v402_v15 = vld [vmem:[#allocation7 + $0x10] sm:$0xff]  }
  0x2a   :  { %v61_v14 = vld [vmem:[#allocation2] sm:$0xff]  ;;  %v403_v17 = vld [vmem:[#allocation7 + $0x8] sm:$0xff]   ;;  %v404_v18 = vld [vmem:[#allocation7] sm:$0xff]  }
  0x2b   :  { %v62_v16 = vpack.c.bf16 %v61_v14, %v61_v14  ;;  %v305_v19 = vld [vmem:[%s549_s2] ss:$0 sm:$0xff]  ;;  %s465_s2 = scalar_lea.vmem %s296_s12, 128 }
  0x2c   :  { %344 = vmatpush3.bf16.msra.mxu0 %v390_v2  ;;  %364 = vmatpush3.bf16.msra.mxu1 %v398_v6  ;;  %v314_v27 = vld [vmem:[%s551_s4] ss:$0 sm:$0xff]  ;;  %p466_p1 = scmp.ne.s32.totalorder %s296_s12, %s465_s2  ;;  %p471_p3 = scmp.lt.s32.totalorder %s465_s2, %s465_s2 }
  0x2d   :  { %345 = vmatprep.subr.bf16.mxu0 %v496_v0  ;;  %365 = vmatprep.subr.bf16.mxu1 %v496_v0 }
  0x2e   :  { %p472_p4 = por %p471_p3, %p470_p2 }
  0x30   :  { %346 = vmatpush3.bf16.msra.mxu0 %v391_v3  ;;  %366 = vmatpush3.bf16.msra.mxu1 %v399_v8  ;;  %p473_p5 = pnand %p472_p4, %p466_p1 }
  0x31   :  { %347 = vmatprep.subr.bf16.mxu0 %v496_v0  ;;  %367 = vmatprep.subr.bf16.mxu1 %v496_v0 }
  0x34   :  { %348 = vmatpush3.bf16.msra.mxu0 %v392_v5  ;;  %368 = vmatpush3.bf16.msra.mxu1 %v400_v10 }
  0x35   :  { %349 = vmatprep.subr.bf16.mxu0 %v496_v0  ;;  %369 = vmatprep.subr.bf16.mxu1 %v496_v0 }
  0x38   :  { %350 = vmatpush3.bf16.msra.mxu0 %v393_v7  ;;  %370 = vmatpush3.bf16.msra.mxu1 %v401_v12 }
  0x39   :  { %351 = vmatprep.subr.bf16.mxu0 %v496_v0  ;;  %371 = vmatprep.subr.bf16.mxu1 %v496_v0 }
  0x3c   :  { %352 = vmatpush3.bf16.msra.mxu0 %v394_v9  ;;  %372 = vmatpush3.bf16.msra.mxu1 %v402_v15 }
  0x3d   :  { %353 = vmatprep.subr.bf16.mxu0 %v496_v0  ;;  %373 = vmatprep.subr.bf16.mxu1 %v496_v0 }
  0x40   :  { %354 = vmatpush3.bf16.msra.mxu0 %v395_v11  ;;  %374 = vmatpush3.bf16.msra.mxu1 %v403_v17 }
  0x41   :  { %355 = vmatprep.subr.bf16.mxu0 %v496_v0  ;;  %375 = vmatprep.subr.bf16.mxu1 %v496_v0 }
  0x44   :  { %356 = vmatpush3.bf16.msra.mxu0 %v396_v13  ;;  %376 = vmatpush3.bf16.msra.mxu1 %v404_v18 }
  0x47   :  { %358 = vmatmul.mubr.bf16.vlgmr.msra.gmra.mxu0 %v62_v16 }
 0x107   :  { %v168_v20 = vpop.f32.mrf.mxu0 }
 0x108   :  { %v169_v21 = vadd.f32 %v305_v19, %v168_v20 }
 0x109   :  { %v359_v22 = vpop.f32.mrf.mxu0 }
 0x10a   :  { %v174_v23 = vmax.f32 %v169_v21, 0.0 }
 0x10b   :  { %v171_v24 = vpop.f32.mrf.mxu0 }
 0x10c   :  { %v175_v25 = vpack.c.bf16 %v174_v23, %v174_v23 }
 0x10d   :  { %v360_v26 = vpop.f32.mrf.mxu0 }
 0x10e   :  { %378 = vmatmul.mubr.bf16.vlgmr.msra.gmra.mxu1 %v175_v25 }
 0x1ce   :  { %v281_v28 = vpop.f32.mrf.mxu1 }
 0x1cf   :  { %v282_v29 = vadd.f32 %v314_v27, %v281_v28 }
 0x1d0   :  { %v379_v30 = vpop.f32.mrf.mxu1 }
 0x1d1   :  { %v287_v31 = vmax.f32 %v282_v29, 0.0 }
 0x1d2   :  { %v284_v32 = vpop.f32.mrf.mxu1 }
 0x1d3   :  { %288 = vst [vmem:[#allocation8] sm:$0xff] %v287_v31 }
 0x1d4   :  { %v380_v33 = vpop.f32.mrf.mxu1 }
 0x1d5   :  { %476 = shalt.err (!%p473_p5)
}
 0x1d6   :  { %298 = dma.vmem_to_hbm [thread:$0]  %s296_s12, 128, %s552_s5, [#allocation4]  }
 0x1d7   :  { %489 = dma.done.wait [#allocation4], 128  }
 0x1d8   :  { %490 = vsyncadd [#allocation4], 4294967168 }
 0x1d9   :  { %302 = vsyncpa [#allocation3], 1 }
 0x1da   :  { %303 = vsyncpa [#allocation6], 1 }
 0x1db   :  { %304 = vsyncpa [#allocation4], 1 }

</bundles_post_ra>
